<compile_context>
chip_gen: v6e
topology: v6e:2x2x1
jax: 0.10.0
libtpu: 0.0.40
codegen_flags: <defaults>
</compile_context>

<pallas_src>
import numpy as np

import jax
import jax.numpy as jnp
from jax.experimental import pallas as pl
from jax.experimental.pallas import tpu as pltpu

_LANES = 128


def _make_operator_action_kernel(write_mask: int, num_ops: int):
    """Build the elementwise FSM-update kernel with the (static) write mask
    baked in as a constant."""

    def kernel(state_ref, op_ref, pred_ref, out_ref):
        state = state_ref[...]                       # (bm, C) int32
        op = op_ref[...].astype(jnp.int32)           # widen in-register (VPU)
        pred = pred_ref[...]                         # (bm, 1) or (bm, C) int32

        # O(1) table lookup: bit `op` of the packed write mask.
        # Out-of-range ops (op < 0 or op >= num_ops) preserve the state.
        valid = jnp.logical_and(op >= 0, op < num_ops)
        shift = jnp.clip(op, 0, 31).astype(jnp.uint32)
        flag = jnp.bitwise_and(
            jnp.right_shift(jnp.uint32(write_mask), shift), jnp.uint32(1)
        )
        write = jnp.logical_and(valid, flag == jnp.uint32(1))
        out_ref[...] = jnp.where(write, pred, state)

    return kernel


def _tpu_info():
    """(vmem_capacity_bytes, has_two_tensorcores) with safe fallbacks."""
    vmem_cap = 128 << 20
    try:
        info = pltpu.get_tpu_info()
        vmem_cap = int(getattr(info, "vmem_capacity_bytes", vmem_cap))
    except Exception:
        pass
    two_tc = False
    try:
        kind = jax.devices()[0].device_kind.lower()
        two_tc = "v7" in kind          # v7x has 2 TensorCores per chip
    except Exception:
        pass
    return vmem_cap, two_tc


def _choose_bm(rows, cols, pred_cols, *, vmem_budget_bytes, min_grid):
    """Largest batch tile that fits the VMEM budget (double-buffered) while
    leaving at least `min_grid` grid steps (so 2-TC chips shard the grid)."""
    if rows <= 8:
        return rows
    per_row = 2 * 4 * (3 * cols + pred_cols)      # double-buffered int32 streams
    cap = max(8, vmem_budget_bytes // per_row)
    target = max(8, min(rows, cap, pl.cdiv(rows, min_grid)))
    if target >= rows:
        return rows                                # one full block (single-TC chips)
    bm = max(8, (target // 8) * 8)
    d, steps = bm, 0
    while d >= 8 and steps < 4096:                 # prefer an exact divisor of rows
        if rows % d == 0:
            return d
        d -= 8
        steps += 1
    return bm                                      # partial last block (writes masked)


def operator_action(state, operation, prediction, *, write_flags,
                    donate_state=False, bm=None):
    """Apply the registered operator action to the FSM state tensor.

    write_flags must be a static (host-side) sequence: flag k nonzero means
    "operator k writes `prediction` into the channel".
    """
    flags = np.asarray(write_flags).reshape(-1)
    num_ops = int(flags.shape[0])
    assert num_ops <= 32, "bitmask path supports up to 32 registered operators"
    write_mask = 0
    for k, f in enumerate(flags.tolist()):
        if f != 0:
            write_mask |= (1 << k)

    B, C = state.shape
    if state.dtype != jnp.int32:
        state = state.astype(jnp.int32)
    pred = prediction.astype(jnp.int32)

    # ---- layout: guarantee a lane-dense (multiple-of-128) last dim if possible.
    if C % _LANES != 0 and (B * C) % _LANES == 0:
        rows, cols = (B * C) // _LANES, _LANES
        st2d = state.reshape(rows, cols)
        op2d = operation.reshape(rows, cols)
        # TODO(synk): this materializes a (B, C) copy of `prediction`; worth it
        # for small C (unmasked full-lane stores), revisit if C is large.
        pr2d = jnp.broadcast_to(pred.reshape(B, 1), (B, C)).reshape(rows, cols)
        pred_cols = cols
        flattened = True
    else:
        rows, cols = B, C
        st2d, op2d = state, operation
        pr2d = pred.reshape(B, 1)
        pred_cols = 1
        flattened = False
        # TODO(synk): if C % 128 != 0 here as well, stores are masked; pad the
        # channel dim upstream if this configuration is ever hot.

    # ---- generation-aware tile / VMEM sizing.
    vmem_cap, two_tc = _tpu_info()
    data_budget = max(4 << 20, min(vmem_cap // 3, 48 << 20))
    vmem_limit = int(min(vmem_cap * 3 // 4, 100 << 20))
    min_grid = 2 if two_tc else 1
    if bm is None:
        bm = _choose_bm(rows, cols, pred_cols,
                        vmem_budget_bytes=data_budget, min_grid=min_grid)
    assert 1 <= bm <= rows
    grid = (pl.cdiv(rows, bm),)

    # ---- operation dtype: stream natively; never add a wrapper-side cast pass
    # unless the incoming dtype cannot be tiled/loaded directly.
    if op2d.dtype == jnp.int8 and bm % 32 == 0:
        op_bytes = 1                      # int8 arrived upstream: keep it
    else:
        if op2d.dtype != jnp.int32:
            op2d = op2d.astype(jnp.int32)
        op_bytes = 4

    kernel = _make_operator_action_kernel(write_mask, num_ops)
    bytes_accessed = rows * cols * (4 + 4 + op_bytes) + rows * pred_cols * 4

    out2d = pl.pallas_call(
        kernel,
        out_shape=jax.ShapeDtypeStruct((rows, cols), jnp.int32),
        grid=grid,
        in_specs=[
            pl.BlockSpec((bm, cols), lambda i: (i, 0)),       # state
            pl.BlockSpec((bm, cols), lambda i: (i, 0)),       # operation
            pl.BlockSpec((bm, pred_cols), lambda i: (i, 0)),  # prediction
        ],
        out_specs=pl.BlockSpec((bm, cols), lambda i: (i, 0)),
        compiler_params=pltpu.CompilerParams(
            dimension_semantics=("parallel",),
            vmem_limit_bytes=vmem_limit,
        ),
        cost_estimate=pl.CostEstimate(
            flops=6 * rows * cols,
            transcendentals=0,
            bytes_accessed=bytes_accessed,
        ),
        input_output_aliases=({0: 0} if donate_state else {}),
    )(st2d, op2d, pr2d)

    return out2d.reshape(B, C) if flattened else out2d


if __name__ == "__main__":
    # TODO(synk): OperatorAction.forward is abstract in the source; the concrete
    # "write-on-flagged-op" semantics implemented here is one valid subclass.
    WRITE_FLAGS = (0, 1, 0, 1, 1)     # registered operators 1, 3, 4 are writes
    NUM_OPS = len(WRITE_FLAGS)
    wt = jnp.asarray(WRITE_FLAGS, dtype=jnp.int32)

    key = jax.random.PRNGKey(0)
    k1, k2, k3, k4, k5, k6 = jax.random.split(key, 6)

    # --- check 1: lane-dense path (C multiple of 128), jit + state aliasing ---
    B, C = 16, 128
    state = jax.random.randint(k1, (B, C), 0, 100, dtype=jnp.int32)
    operation = jax.random.randint(k2, (B, C), 0, NUM_OPS, dtype=jnp.int32)
    prediction = jax.random.randint(k3, (B,), 0, 10, dtype=jnp.int32)

    fwd = jax.jit(lambda s, o, p: operator_action(
        s, o, p, write_flags=WRITE_FLAGS, donate_state=True))
    out = jax.block_until_ready(fwd(state, operation, prediction))

    ref = jnp.where(wt[operation] != 0, prediction[:, None], state)
    assert out.shape == (B, C) and out.dtype == jnp.int32
    assert jnp.array_equal(out, ref), "Pallas kernel mismatch vs reference (check 1)"

    # --- check 2: small-channel FSM (C=16) exercising the flattened lane-dense path ---
    B2, C2 = 8, 16
    state2 = jax.random.randint(k4, (B2, C2), 0, 100, dtype=jnp.int32)
    operation2 = jax.random.randint(k5, (B2, C2), 0, NUM_OPS, dtype=jnp.int32)
    prediction2 = jax.random.randint(k6, (B2,), 0, 10, dtype=jnp.int32)

    out2 = jax.block_until_ready(
        operator_action(state2, operation2, prediction2, write_flags=WRITE_FLAGS))
    ref2 = jnp.where(wt[operation2] != 0, prediction2[:, None], state2)
    assert out2.shape == (B2, C2) and out2.dtype == jnp.int32
    assert jnp.array_equal(out2, ref2), "Pallas kernel mismatch vs reference (check 2)"

    print("KERNEL_OK")
</pallas_src>

<mosaic_0001>
module attributes {stable_mosaic.version = 11 : i64} {
  func.func @kernel(%arg0: i32, %arg1: memref<16x128xi32, #tpu.memory_space<vmem>>, %arg2: memref<16x128xi32, #tpu.memory_space<vmem>>, %arg3: memref<16x1xi32, #tpu.memory_space<vmem>>, %arg4: memref<16x128xi32, #tpu.memory_space<vmem>>) attributes {dimension_semantics = [#tpu.dimension_semantics<parallel>], iteration_bounds = array<i64: 1>, scalar_prefetch = 0 : i64, scratch_operands = 0 : i64, tpu.core_type = #tpu.core_type<tc>, window_params = [{transform_indices = @transform_0, window_bounds = array<i64: 16, 128>}, {transform_indices = @transform_1, window_bounds = array<i64: 16, 128>}, {transform_indices = @transform_2, window_bounds = array<i64: 16, 1>}, {transform_indices = @transform_3, window_bounds = array<i64: 16, 128>}]} {
    %c0 = arith.constant 0 : index
    %c0_0 = arith.constant 0 : index
    %0 = vector.load %arg1[%c0, %c0_0] : memref<16x128xi32, #tpu.memory_space<vmem>>, vector<16x128xi32>
    %c0_1 = arith.constant 0 : index
    %c0_2 = arith.constant 0 : index
    %1 = vector.load %arg2[%c0_1, %c0_2] : memref<16x128xi32, #tpu.memory_space<vmem>>, vector<16x128xi32>
    %c0_3 = arith.constant 0 : index
    %c0_4 = arith.constant 0 : index
    %2 = vector.load %arg3[%c0_3, %c0_4] : memref<16x1xi32, #tpu.memory_space<vmem>>, vector<16x1xi32>
    %c0_i32 = arith.constant 0 : i32
    %3 = vector.broadcast %c0_i32 : i32 to vector<16x128xi32>
    %4 = arith.cmpi sge, %1, %3 : vector<16x128xi32>
    %c5_i32 = arith.constant 5 : i32
    %5 = vector.broadcast %c5_i32 : i32 to vector<16x128xi32>
    %6 = arith.cmpi slt, %1, %5 : vector<16x128xi32>
    %7 = arith.andi %4, %6 : vector<16x128xi1>
    %c0_i32_5 = arith.constant 0 : i32
    %c31_i32 = arith.constant 31 : i32
    %8 = vector.broadcast %c0_i32_5 : i32 to vector<16x128xi32>
    %9 = arith.maxsi %8, %1 : vector<16x128xi32>
    %10 = vector.broadcast %c31_i32 : i32 to vector<16x128xi32>
    %11 = arith.minsi %10, %9 : vector<16x128xi32>
    %c26_i32 = arith.constant 26 : i32
    %12 = vector.broadcast %c26_i32 : i32 to vector<16x128xi32>
    %13 = arith.shrui %12, %11 : vector<16x128xi32>
    %c1_i32 = arith.constant 1 : i32
    %14 = vector.broadcast %c1_i32 : i32 to vector<16x128xi32>
    %15 = arith.andi %13, %14 : vector<16x128xi32>
    %c1_i32_6 = arith.constant 1 : i32
    %16 = vector.broadcast %c1_i32_6 : i32 to vector<16x128xi32>
    %17 = arith.cmpi eq, %15, %16 : vector<16x128xi32>
    %18 = arith.andi %7, %17 : vector<16x128xi1>
    %19 = vector.shape_cast %2 : vector<16x1xi32> to vector<16x1xi32>
    %20 = vector.broadcast %19 : vector<16x1xi32> to vector<16x128xi32>
    %21 = arith.select %18, %20, %0 : vector<16x128xi1>, vector<16x128xi32>
    %c0_7 = arith.constant 0 : index
    %c0_8 = arith.constant 0 : index
    %22 = vector.load %arg4[%c0_7, %c0_8] : memref<16x128xi32, #tpu.memory_space<vmem>>, vector<16x128xi32>
    tpu.vector_store %arg4[%c0_7, %c0_8], %21 {strides = array<i32>} : memref<16x128xi32, #tpu.memory_space<vmem>>, vector<16x128xi32>,
    return
  }
  func.func @transform_0(%arg0: i32) -> (i32, i32) {
    %c0_i32 = arith.constant 0 : i32
    %c0_i32_0 = arith.constant 0 : i32
    return %arg0, %c0_i32 : i32, i32
  }
  func.func @transform_1(%arg0: i32) -> (i32, i32) {
    %c0_i32 = arith.constant 0 : i32
    %c0_i32_0 = arith.constant 0 : i32
    return %arg0, %c0_i32 : i32, i32
  }
  func.func @transform_2(%arg0: i32) -> (i32, i32) {
    %c0_i32 = arith.constant 0 : i32
    %c0_i32_0 = arith.constant 0 : i32
    return %arg0, %c0_i32 : i32, i32
  }
  func.func @transform_3(%arg0: i32) -> (i32, i32) {
    %c0_i32 = arith.constant 0 : i32
    %c0_i32_0 = arith.constant 0 : i32
    return %arg0, %c0_i32 : i32, i32
  }
}

</mosaic_0001>

<bundles_post_ra>
// kernel: _lambda_.1
= control target key start
LH: loop header
LB: loop body
LE: loop exit
PB: predicated region body
PF: predicated region fallthrough
CT: control target
= control target key end

     0   :  { %8 = vsyncpa [#allocation3], 0  ;;  %s185_s0 = inlined_call_operand.hbm [shape: s32[16,128], index: 0, kind: input, shape index: {}, may-alias: {0,3}]   ;;  %s186_s1 = inlined_call_operand.vmem [shape: s32[16,128], index: 1, kind: input, shape index: {}]   ;;  %s187_s2 = inlined_call_operand.vmem [shape: s32[16,1], index: 2, kind: input, shape index: {}]   ;;  %s188_s3 = inlined_call_operand.hbm [shape: s32[16,128], index: 3, kind: output, shape index: {}, may-alias: {0,3}]  }
   0x1   :  { %9 = vsyncpa [#allocation4], 0  ;;  %s135_s12 = smov [#allocation2]  }
   0x2   :  { %s15_s13 = sshll.u32 %s135_s12, 4  ;;  %s16_s13 = int_to_ptr.vmem [resolvable:$true] %s15_s13 }
   0x3   :  { %s99_s14 = scalar_lea.vmem %s16_s13, 256  ;;  %p104_p1 = scmp.lt.s32.totalorder %s16_s13, %s16_s13 }
   0x4   :  { %p100_p0 = scmp.ne.s32.totalorder %s16_s13, %s99_s14  ;;  %p105_p2 = scmp.lt.s32.totalorder %s99_s14, %s99_s14 }
   0x6   :  { %p106_p3 = por %p105_p2, %p104_p1 }
   0x8   :  { %p107_p4 = pnand %p106_p3, %p100_p0 }
   0xa   :  { %110 = shalt.err (!%p107_p4)
}
   0xb   :  { %s136_s15 = smov 128   ;;  %s137_s16 = smov 8  }
   0xc   :  { %21 = dma.hbm_to_vmem [thread:$0]  %s185_s0, 256, %s16_s13, [#allocation3], %s136_s15, %s136_s15, %s137_s16  }
   0xd   :  { %131 = dma.done.wait [#allocation3], 256  }
   0xe   :  { %132 = vsyncadd [#allocation3], 4294967040  ;;  %v138_v0 = vmov 0   ;;  %v33_v1 = vld [vmem:[%s187_s2] sm:$0xff]  ;;  %v34_v2 = vld [vmem:[%s187_s2 + $0x8] sm:$0xff]  ;;  %v139_v8 = vmov 26  }
   0xf   :  { %90 = vset.pattern.permute.xlu0 %v138_v0  ;;  %v31_v3 = vld [vmem:[%s186_s1] sm:$0xff]  ;;  %v32_v4 = vld [vmem:[%s186_s1 + $0x8] sm:$0xff]  ;;  %s140_s1 = smov [#allocation5]  }
  0x10   :  { %58 = vperm.xlu0 %90, %v33_v1   ;;  %vm41_vm0 = vcmp.gt.s32.totalorder %v31_v3, 0  ;;  %vm43_vm1 = vcmp.gt.s32.totalorder %v32_v4, 0  ;;  %vm35_vm4 = vcmp.ge.s32.totalorder %v31_v3, 0  ;;  %vm37_vm5 = vcmp.lt.s32.totalorder %v31_v3, 5  ;;  %v29_v14 = vld [vmem:[#allocation2] sm:$0xff]  ;;  %s72_s2 = sshll.u32 %s140_s1, 4  ;;  %s73_s2 = int_to_ptr.vmem [resolvable:$true] %s72_s2 }
  0x11   :  { %v42_v5 = vsel %vm41_vm0, %v31_v3, 0  ;;  %v44_v6 = vsel %vm43_vm1, %v32_v4, 0  ;;  %vm39_vm6 = vmand %vm35_vm4, %vm37_vm5  ;;  %vm36_vm8 = vcmp.ge.s32.totalorder %v32_v4, 0  ;;  %vm38_vm9 = vcmp.lt.s32.totalorder %v32_v4, 5  ;;  %v30_v17 = vld [vmem:[#allocation2 + $0x8] sm:$0xff]  ;;  %s111_s26 = scalar_lea.vmem %s73_s2, 256  ;;  %p116_p6 = scmp.lt.s32.totalorder %s73_s2, %s73_s2 }
  0x12   :  { %vm45_vm2 = vcmp.lt.s32.totalorder %v42_v5, 31  ;;  %vm47_vm3 = vcmp.lt.s32.totalorder %v44_v6, 31  ;;  %vm40_vm11 = vmand %vm36_vm8, %vm38_vm9  ;;  %p112_p5 = scmp.ne.s32.totalorder %s73_s2, %s111_s26  ;;  %p117_p7 = scmp.lt.s32.totalorder %s111_s26, %s111_s26 }
  0x13   :  { %v46_v7 = vsel %vm45_vm2, %v42_v5, 31  ;;  %v48_v10 = vsel %vm47_vm3, %v44_v6, 31 }
  0x14   :  { %61 = vperm.xlu0 %90, %v34_v2   ;;  %v49_v9 = vshrl.u32 %v139_v8, %v46_v7  ;;  %v50_v12 = vshrl.u32 %v139_v8, %v48_v10  ;;  %p118_p8 = por %p117_p7, %p116_p6 }
  0x16   :  { %v51_v11 = vand.u32 1, %v49_v9  ;;  %v52_v13 = vand.u32 1, %v50_v12  ;;  %p119_p9 = pnand %p118_p8, %p112_p5 }
  0x18   :  { %vm53_vm7 = vcmp.eq.s32.totalorder %v51_v11, 1  ;;  %vm54_vm12 = vcmp.eq.s32.totalorder %v52_v13, 1 }
  0x19   :  { %vm55_vm10 = vmand %vm39_vm6, %vm53_vm7 }
  0x1a   :  { %vm56_vm13 = vmand %vm40_vm11, %vm54_vm12 }
  0x8b   :  { %v59_v15 = vpop.permute.xlu0 %58 }
  0x8c   :  { %v63_v16 = vsel %vm55_vm10, %v59_v15, %v29_v14 }
  0x8d   :  { %65 = vst [vmem:[#allocation5] sm:$0xff] %v63_v16 }
  0x8f   :  { %v62_v18 = vpop.permute.xlu0 %61 }
  0x90   :  { %v64_v19 = vsel %vm56_vm13, %v62_v18, %v30_v17 }
  0x91   :  { %66 = vst [vmem:[#allocation5 + $0x8] sm:$0xff] %v64_v19 }
  0x92   :  { %122 = shalt.err (!%p119_p9)
}
  0x93   :  { %78 = dma.vmem_to_hbm [thread:$0]  %s73_s2, 256, %s188_s3, [#allocation4], %s136_s15, %s136_s15, %s137_s16  }
  0x94   :  { %133 = dma.done.wait [#allocation4], 256  }
  0x95   :  { %134 = vsyncadd [#allocation4], 4294967040 }
  0x96   :  { %82 = vsyncpa [#allocation3], 1 }
  0x97   :  { %83 = vsyncpa [#allocation4], 1 }

</bundles_post_ra>
